<compile_context>
chip_gen: v6e
topology: v6e:2x2x1
jax: 0.10.0
libtpu: 0.0.40
codegen_flags: <defaults>
</compile_context>

<pallas_src>
import jax
import jax.numpy as jnp
from jax.experimental import pallas as pl
from jax.experimental.pallas import tpu as pltpu


def _choose_tiles(n, d):
    """Lane-dense tiles targeting ~4 MiB f32 x/h blocks (t_n * t_d * 4 bytes)."""
    t_d = d if d <= 2048 else 2048          # full row, or a multiple of 128
    t_n = n if n <= 512 else 512            # full batch dim, or a multiple of 8
    return t_n, t_d


def _make_fused_kernel(sigma):
    """h = x * sigmoid(params * sigma); att written once per D-tile."""

    def kernel(p_ref, x_ref, att_ref, h_ref):
        # Sigmoid goes to the EUP slot; it is free filler under the DMA-bound multiply.
        att = jax.nn.sigmoid(p_ref[...] * sigma)

        # att output block index is constant along the inner N axis -> write once.
        @pl.when(pl.program_id(1) == 0)
        def _():
            att_ref[...] = att

        # Broadcast (1, tD) over (tN, tD).
        h_ref[...] = x_ref[...] * att

    return kernel


def forgetting_layer(x, params, sigma=10.0):
    """Forward pass of ForgettingLayer (flags='pixel').

    Args:
      x:      (N, C, H, W) float32 input (NCHW, like PyTorch).
      params: (1, C, H, W) float32 learnable parameter.
      sigma:  python scalar.

    Returns:
      (params, att, h_) exactly like the PyTorch module.
    """
    N, C, H, W = x.shape
    assert params.shape == (1, C, H, W)
    D = C * H * W

    x2 = x.reshape(N, D)
    p2 = params.reshape(1, D)

    t_n, t_d = _choose_tiles(N, D)
    n_n = pl.cdiv(N, t_n)
    n_d = pl.cdiv(D, t_d)

    att2, h2 = pl.pallas_call(
        _make_fused_kernel(float(sigma)),
        out_shape=(
            jax.ShapeDtypeStruct((1, D), jnp.float32),   # att
            jax.ShapeDtypeStruct((N, D), jnp.float32),   # h_
        ),
        grid_spec=pltpu.PrefetchScalarGridSpec(
            num_scalar_prefetch=0,
            grid=(n_d, n_n),  # D outer (parallel / 2-TC shard), N inner (arbitrary)
            in_specs=[
                pl.BlockSpec((1, t_d), lambda j, i: (0, j)),     # params (const on N)
                pl.BlockSpec((t_n, t_d), lambda j, i: (i, j)),   # x
            ],
            out_specs=[
                pl.BlockSpec((1, t_d), lambda j, i: (0, j)),     # att (const on N)
                pl.BlockSpec((t_n, t_d), lambda j, i: (i, j)),   # h_
            ],
        ),
        compiler_params=pltpu.CompilerParams(
            dimension_semantics=("parallel", "arbitrary"),
            vmem_limit_bytes=40 << 20,
        ),
        cost_estimate=pl.CostEstimate(
            flops=int(2 * N * D),
            transcendentals=int(D),
            bytes_accessed=int((2 * N * D + 2 * D) * 4),
        ),
    )(p2, x2)

    att = att2.reshape(1, C, H, W)
    h_ = h2.reshape(N, C, H, W)
    return params, att, h_


def _check(x, params, sigma):
    p_out, att, h_ = forgetting_layer(x, params, sigma=sigma)
    jax.block_until_ready((p_out, att, h_))
    att_ref = 1.0 / (1.0 + jnp.exp(-params * sigma))
    h_ref = x * att_ref
    assert jnp.allclose(att, att_ref, atol=1e-6, rtol=1e-5)
    assert jnp.allclose(h_, h_ref, atol=1e-6, rtol=1e-5)
    assert jnp.array_equal(p_out, params)


if __name__ == "__main__":
    sigma = 10.0
    key = jax.random.PRNGKey(0)

    # Case 1: module-sized example, shape=(C,H,W)=(4,16,16), batch=2, D=1024 (aligned).
    k1, k2, k3, k4 = jax.random.split(key, 4)
    N, C, H, W = 2, 4, 16, 16
    x = jax.random.normal(k1, (N, C, H, W), dtype=jnp.float32)
    params = jax.random.normal(k2, (1, C, H, W), dtype=jnp.float32)
    _check(x, params, sigma)

    # Case 2: misaligned D (= 3*30*30 = 2700) > t_d to exercise the ragged edge tile.
    N2, C2, H2, W2 = 4, 3, 30, 30
    x2 = jax.random.normal(k3, (N2, C2, H2, W2), dtype=jnp.float32)
    params2 = jax.random.normal(k4, (1, C2, H2, W2), dtype=jnp.float32)
    _check(x2, params2, sigma)

    print("KERNEL_OK")
</pallas_src>

<mosaic_0001>
module attributes {stable_mosaic.version = 11 : i64} {
  func.func @kernel(%arg0: i32, %arg1: i32, %arg2: memref<1x1024xf32, #tpu.memory_space<vmem>>, %arg3: memref<2x1024xf32, #tpu.memory_space<vmem>>, %arg4: memref<1x1024xf32, #tpu.memory_space<vmem>>, %arg5: memref<2x1024xf32, #tpu.memory_space<vmem>>) attributes {dimension_semantics = [#tpu.dimension_semantics<parallel>, #tpu.dimension_semantics<arbitrary>], iteration_bounds = array<i64: 1, 1>, scalar_prefetch = 0 : i64, scratch_operands = 0 : i64, tpu.core_type = #tpu.core_type<tc>, window_params = [{transform_indices = @transform_0, window_bounds = array<i64: 1, 1024>}, {transform_indices = @transform_1, window_bounds = array<i64: 2, 1024>}, {transform_indices = @transform_2, window_bounds = array<i64: 1, 1024>}, {transform_indices = @transform_3, window_bounds = array<i64: 2, 1024>}]} {
    %c0 = arith.constant 0 : index
    %c0_0 = arith.constant 0 : index
    %0 = vector.load %arg2[%c0, %c0_0] : memref<1x1024xf32, #tpu.memory_space<vmem>>, vector<1x1024xf32>
    %cst = arith.constant 1.000000e+01 : f32
    %1 = vector.broadcast %cst : f32 to vector<1x1024xf32>
    %2 = arith.mulf %0, %1 : vector<1x1024xf32>
    %3 = arith.negf %2 : vector<1x1024xf32>
    %4 = math.exp %3 : vector<1x1024xf32>
    %cst_1 = arith.constant 1.000000e+00 : f32
    %5 = vector.broadcast %cst_1 : f32 to vector<1x1024xf32>
    %6 = arith.addf %5, %4 : vector<1x1024xf32>
    %7 = arith.divf %5, %6 : vector<1x1024xf32>
    %c0_i32 = arith.constant 0 : i32
    %8 = arith.cmpi eq, %arg1, %c0_i32 : i32
    %9 = arith.extui %8 : i1 to i32
    %c0_i32_2 = arith.constant 0 : i32
    %10 = arith.cmpi ne, %9, %c0_i32_2 : i32
    scf.if %10 {
      %c0_7 = arith.constant 0 : index
      %c0_8 = arith.constant 0 : index
      %15 = vector.load %arg4[%c0_7, %c0_8] : memref<1x1024xf32, #tpu.memory_space<vmem>>, vector<1x1024xf32>
      tpu.vector_store %arg4[%c0_7, %c0_8], %7 {strides = array<i32>} : memref<1x1024xf32, #tpu.memory_space<vmem>>, vector<1x1024xf32>,
    } else {
    }
    %c0_3 = arith.constant 0 : index
    %c0_4 = arith.constant 0 : index
    %11 = vector.load %arg3[%c0_3, %c0_4] : memref<2x1024xf32, #tpu.memory_space<vmem>>, vector<2x1024xf32>
    %12 = vector.broadcast %7 : vector<1x1024xf32> to vector<2x1024xf32>
    %13 = arith.mulf %11, %12 : vector<2x1024xf32>
    %c0_5 = arith.constant 0 : index
    %c0_6 = arith.constant 0 : index
    %14 = vector.load %arg5[%c0_5, %c0_6] : memref<2x1024xf32, #tpu.memory_space<vmem>>, vector<2x1024xf32>
    tpu.vector_store %arg5[%c0_5, %c0_6], %13 {strides = array<i32>} : memref<2x1024xf32, #tpu.memory_space<vmem>>, vector<2x1024xf32>,
    return
  }
  func.func @transform_0(%arg0: i32, %arg1: i32) -> (i32, i32) {
    %c0_i32 = arith.constant 0 : i32
    %c0_i32_0 = arith.constant 0 : i32
    return %c0_i32, %arg0 : i32, i32
  }
  func.func @transform_1(%arg0: i32, %arg1: i32) -> (i32, i32) {
    %c0_i32 = arith.constant 0 : i32
    return %arg1, %arg0 : i32, i32
  }
  func.func @transform_2(%arg0: i32, %arg1: i32) -> (i32, i32) {
    %c0_i32 = arith.constant 0 : i32
    %c0_i32_0 = arith.constant 0 : i32
    return %c0_i32, %arg0 : i32, i32
  }
  func.func @transform_3(%arg0: i32, %arg1: i32) -> (i32, i32) {
    %c0_i32 = arith.constant 0 : i32
    return %arg1, %arg0 : i32, i32
  }
}

</mosaic_0001>

<bundles_post_ra>
// kernel: tpu_custom_call.1
= control target key start
LH: loop header
LB: loop body
LE: loop exit
PB: predicated region body
PF: predicated region fallthrough
CT: control target
= control target key end

     0   :  { %9 = vsyncpa [#allocation3], 0  ;;  %s292_s0 = inlined_call_operand.hbm [shape: f32[1,1024], index: 0, kind: input, shape index: {}]   ;;  %s293_s1 = inlined_call_operand.hbm [shape: f32[2,1024], index: 1, kind: input, shape index: {}]   ;;  %s294_s2 = inlined_call_operand.hbm [shape: f32[1,1024], index: 2, kind: output, shape index: {0}]   ;;  %s295_s3 = inlined_call_operand.hbm [shape: f32[2,1024], index: 3, kind: output, shape index: {1}]  }
   0x1   :  { %10 = vsyncpa [#allocation6], 0 }
   0x2   :  { %11 = vsyncpa [#allocation4], 0 }
   0x3   :  { %12 = vsyncpa [#allocation9], 0  ;;  %s255_s12 = smov [#allocation2]   ;;  %s256_s14 = smov [#allocation5]  }
   0x4   :  { %s19_s13 = sshll.u32 %s255_s12, 4  ;;  %s29_s15 = sshll.u32 %s256_s14, 4  ;;  %s20_s13 = int_to_ptr.vmem [resolvable:$true] %s19_s13  ;;  %s30_s15 = int_to_ptr.vmem [resolvable:$true] %s29_s15 }
   0x5   :  { %s175_s16 = scalar_lea.vmem %s20_s13, 128  ;;  %p180_p1 = scmp.lt.s32.totalorder %s20_s13, %s20_s13 }
   0x6   :  { %p176_p0 = scmp.ne.s32.totalorder %s20_s13, %s175_s16  ;;  %p181_p2 = scmp.lt.s32.totalorder %s175_s16, %s175_s16 }
   0x8   :  { %p182_p3 = por %p181_p2, %p180_p1 }
   0xa   :  { %p183_p4 = pnand %p182_p3, %p176_p0 }
   0xc   :  { %186 = shalt.err (!%p183_p4)
}
   0xd   :  { %22 = dma.hbm_to_vmem [thread:$0]  %s292_s0, 128, %s20_s13, [#allocation3]  }
   0xe   :  { %s195_s19 = scalar_lea.vmem %s30_s15, 256  ;;  %p200_p6 = scmp.lt.s32.totalorder %s30_s15, %s30_s15 }
   0xf   :  { %p196_p5 = scmp.ne.s32.totalorder %s30_s15, %s195_s19  ;;  %p201_p7 = scmp.lt.s32.totalorder %s195_s19, %s195_s19 }
  0x11   :  { %p202_p8 = por %p201_p7, %p200_p6 }
  0x13   :  { %p203_p9 = pnand %p202_p8, %p196_p5 }
  0x15   :  { %206 = shalt.err (!%p203_p9)
}
  0x16   :  { %32 = dma.hbm_to_vmem [thread:$0]  %s293_s1, 256, %s30_s15, [#allocation6]  }
  0x17   :  { %247 = dma.done.wait [#allocation3], 128  }
  0x18   :  { %248 = vsyncadd [#allocation3], 4294967168 }
  0x19   :  { %249 = dma.done.wait [#allocation6], 256  }
  0x1a   :  { %250 = vsyncadd [#allocation6], 4294967040  ;;  %v39_v0 = vld [vmem:[#allocation2] sm:$0xff]  ;;  %v55_v5 = vlaneseq  ;;  %v257_v6 = vmov 1983009808   ;;  %s258_s0 = smov [#allocation7]  }
  0x1b   :  { %v157_v1 = vmul.f32 -10.0, %v39_v0  ;;  %v90_v7 = vunpack.c.l.s4 %v257_v6  ;;  %s133_s22 = sshll.u32 %s258_s0, 4  ;;  %s134_s22 = int_to_ptr.vmem [resolvable:$true] %s133_s22 }
  0x1c   :  { %v56_v8 = vshrl.u32 %v55_v5, 7  ;;  %s207_s1 = scalar_lea.vmem %s134_s22, 128  ;;  %p212_p11 = scmp.lt.s32.totalorder %s134_s22, %s134_s22 }
  0x1d   :  { %v42_v2 = vmul.f32 1.442695, %v157_v1  ;;  %v91_v9 = vunpack.c.0.s8 %v90_v7  ;;  %p208_p10 = scmp.ne.s32.totalorder %s134_s22, %s207_s1  ;;  %p213_p12 = scmp.lt.s32.totalorder %s207_s1, %s207_s1 }
  0x1e   :  { %v57_v10 = vsub.s32 0, %v56_v8  ;;  %v61_v11 = vsub.s32 1, %v56_v8  ;;  %v65_v12 = vsub.s32 2, %v56_v8  ;;  %v69_v13 = vsub.s32 3, %v56_v8 }
  0x1f   :  { %163 = vpow2.f32 %v42_v2  ;;  %v73_v14 = vsub.s32 4, %v56_v8  ;;  %v77_v15 = vsub.s32 5, %v56_v8  ;;  %v81_v16 = vsub.s32 6, %v56_v8  ;;  %p214_p13 = por %p213_p12, %p212_p11 }
  0x20   :  { %v85_v17 = vsub.s32 7, %v56_v8  ;;  %v94_v19 = vsub.s32 %v91_v9, %v56_v8 }
  0x21   :  { %p215_p0 = pnand %p214_p13, %p208_p10 }
  0x2c   :  { %v164_v3 = vpop.eup %163 }
  0x2d   :  { %v44_v4 = vadd.f32 1.0, %v164_v3 }
  0x2f   :  { %165 = vrcp.f32 %v44_v4 }
  0x3c   :  { %v166_v18 = vpop.eup %165 }
  0x3d   :  { %51 = vst [vmem:[#allocation7] sm:$0xff] %v166_v18  ;;  %v58_v20 = vrot.slane %v166_v18, %v57_v10  ;;  %v62_v21 = vrot.slane %v166_v18, %v61_v11  ;;  %v66_v22 = vrot.slane %v166_v18, %v65_v12  ;;  %v70_v23 = vrot.slane %v166_v18, %v69_v13 }
  0x3e   :  { %v74_v24 = vrot.slane %v166_v18, %v73_v14  ;;  %v78_v25 = vrot.slane %v166_v18, %v77_v15  ;;  %v82_v26 = vrot.slane %v166_v18, %v81_v16  ;;  %v86_v27 = vrot.slane %v166_v18, %v85_v17 }
  0x3f   :  { %218 = shalt.err (!%p215_p0)
}
  0x40   :  { %136 = dma.vmem_to_hbm [thread:$0]  %s134_s22, 128, %s294_s2, [#allocation4]   ;;  %v87_v28 = vcombine.low %v58_v20, %v62_v21  ;;  %v88_v29 = vcombine.low %v66_v22, %v70_v23  ;;  %v104_v30 = vcombine.low %v74_v24, %v78_v25  ;;  %v105_v31 = vcombine.low %v82_v26, %v86_v27  ;;  %v52_v34 = vld [vmem:[#allocation5] sm:$0xff]  ;;  %v53_v38 = vld [vmem:[#allocation5 + $0x8] sm:$0xff] }
  0x41   :  { %s259_s25 = smov [#allocation8]  }
  0x42   :  { %v95_v32 = vrot.slane %v87_v28, %v94_v19  ;;  %v102_v33 = vrot.slane %v88_v29, %v94_v19  ;;  %v112_v35 = vrot.slane %v104_v30, %v94_v19  ;;  %v119_v36 = vrot.slane %v105_v31, %v94_v19  ;;  %s143_s26 = sshll.u32 %s259_s25, 4  ;;  %s144_s26 = int_to_ptr.vmem [resolvable:$true] %s143_s26 }
  0x43   :  { %s227_s2 = scalar_lea.vmem %s144_s26, 256  ;;  %p232_p2 = scmp.lt.s32.totalorder %s144_s26, %s144_s26 }
  0x44   :  { %v103_v37 = vcombine.low %v95_v32, %v102_v33  ;;  %v120_v39 = vcombine.low %v112_v35, %v119_v36  ;;  %p228_p1 = scmp.ne.s32.totalorder %s144_s26, %s227_s2  ;;  %p233_p3 = scmp.lt.s32.totalorder %s227_s2, %s227_s2 }
  0x46   :  { %v123_v40 = vmul.f32 %v103_v37, %v52_v34  ;;  %v124_v41 = vmul.f32 %v120_v39, %v53_v38  ;;  %p234_p4 = por %p233_p3, %p232_p2 }
  0x48   :  { %125 = vst [vmem:[#allocation8] sm:$0xff] %v123_v40  ;;  %126 = vst [vmem:[#allocation8 + $0x8] sm:$0xff] %v124_v41  ;;  %p235_p5 = pnand %p234_p4, %p228_p1 }
  0x4a   :  { %238 = shalt.err (!%p235_p5)
}
  0x4b   :  { %146 = dma.vmem_to_hbm [thread:$0]  %s144_s26, 256, %s295_s3, [#allocation9]  }
  0x4c   :  { %251 = dma.done.wait [#allocation4], 128  }
  0x4d   :  { %252 = vsyncadd [#allocation4], 4294967168 }
  0x4e   :  { %253 = dma.done.wait [#allocation9], 256  }
  0x4f   :  { %254 = vsyncadd [#allocation9], 4294967040 }
  0x50   :  { %153 = vsyncpa [#allocation3], 1 }
  0x51   :  { %154 = vsyncpa [#allocation6], 1 }
  0x52   :  { %155 = vsyncpa [#allocation4], 1 }
  0x53   :  { %156 = vsyncpa [#allocation9], 1 }

</bundles_post_ra>
